<compile_context>
chip_gen: v5e
topology: v5e:2x2
jax: 0.10.0
libtpu: 0.0.40
codegen_flags: <defaults>
</compile_context>

<pallas_src>
import functools

import jax
import jax.numpy as jnp
from jax.experimental import pallas as pl
from jax.experimental.pallas import tpu as pltpu


def _choose_tile_n(n_rows, dim, itemsize):
    """Node-tile size: ~2-4 MiB of real embed payload per grid step, with the
    double-buffered, lane-padded VMEM footprint capped around 24 MiB."""
    lane_padded_dim = -(-dim // 128) * 128
    target_payload = 4 * 1024 * 1024              # real HBM bytes per grid step
    vmem_budget = 24 * 1024 * 1024                # 2 buffers of the embed tile
    tile_n = target_payload // max(dim * itemsize, 1)
    tile_n = min(tile_n, vmem_budget // (2 * lane_padded_dim * itemsize))
    tile_n = max(512, (tile_n // 512) * 512)      # 512: MXU K-chunk + bf16 sublanes
    tile_n = min(tile_n, -(-n_rows // 512) * 512) # don't exceed what N needs
    return int(tile_n)


def _segment_pool_kernel(embed_ref, batch_ref, pooled_ref, count_ref, *,
                         num_videos, num_tiles, tiles_per_core, tile_n, n_rows):
    # embed_ref : (TN, D)  f32/bf16 node-embedding tile (streamed from HBM)
    # batch_ref : (1, TN)  int32 segment id per node (-1 marks padded ids)
    # pooled_ref: (B, D)   f32 per-core partial segment sums (resident over k)
    # count_ref : (B, 1)   f32 per-core partial segment counts
    c = pl.program_id(0)          # core slice ("parallel")
    k = pl.program_id(1)          # node tile within the slice ("arbitrary")

    @pl.when(k == 0)
    def _init():
        pooled_ref[...] = jnp.zeros_like(pooled_ref)
        count_ref[...] = jnp.zeros_like(count_ref)

    global_tile = c * tiles_per_core + k

    def _accumulate():
        seg = batch_ref[...]                                            # (1, TN)
        # Tile-local one-hot membership; padded ids (-1) and any id outside
        # [0, num_videos) never match and contribute nothing (documented
        # precondition: valid ids are in [0, num_videos)).
        row_ids = jax.lax.broadcasted_iota(jnp.int32, (num_videos, tile_n), 0)
        mask = row_ids == seg                                           # (B, TN)

        x = embed_ref[...]                                              # (TN, D)
        if n_rows % tile_n != 0:
            # embed is NOT padded in HBM; rows of the last tile beyond N hold
            # garbage in the pipeline buffer.  Zero them so 0 * NaN/Inf cannot
            # poison the accumulator (the one-hot mask alone is not enough).
            node_ids = global_tile * tile_n + jax.lax.broadcasted_iota(
                jnp.int32, (tile_n, 1), 0)
            x = jnp.where(node_ids < n_rows, x, jnp.zeros_like(x))

        count_ref[...] += jnp.sum(mask.astype(jnp.float32), axis=-1,
                                  keepdims=True)
        # Segment-sum via one-hot matmul: (B, TN) @ (TN, D) -> (B, D), f32 acc.
        # (bf16 embed keeps this bandwidth-bound even on v5e's slower MXU.)
        # NOTE: thread precision=jax.lax.Precision.HIGHEST here if bit-level
        # closeness to an all-f32 reference is required; default precision
        # already meets the 1e-4 check below.
        pooled_ref[...] += jnp.dot(mask.astype(x.dtype), x,
                                   preferred_element_type=jnp.float32)

    if num_tiles == tiles_per_core * pl.num_programs(0) if False else False:
        pass  # (placeholder never taken; static guard handled below)

    # Surplus steps of the last core slice re-read a valid tile (clamped
    # index_map) but must contribute nothing.
    @pl.when(global_tile < num_tiles)
    def _():
        _accumulate()


def _head_epilogue_kernel(pooled_ref, count_ref, w1_ref, b1_ref, w2_ref, b2_ref,
                          out_ref, *, num_cores):
    # pooled_ref: (num_cores, B, D) f32, count_ref: (num_cores, B, 1) f32
    pooled_sum = pooled_ref[0]
    counts = count_ref[0]
    for s in range(1, num_cores):                 # static, tiny
        pooled_sum = pooled_sum + pooled_ref[s]
        counts = counts + count_ref[s]

    # mean = sum / count; empty segments give 0/1 = 0 (scatter-mean convention).
    pooled = pooled_sum / jnp.maximum(counts, 1.0)

    h = jnp.dot(pooled, w1_ref[...], preferred_element_type=jnp.float32)
    h = jnp.maximum(h + b1_ref[...], 0.0)
    # TODO(synk): dropout(p=0.5) is identity in eval mode; training-mode dropout
    # (pltpu.prng_random_bits mask + 2x rescale) is not implemented.
    out = jnp.dot(h, w2_ref[...], preferred_element_type=jnp.float32)
    out_ref[...] = (out + b2_ref[...]).astype(out_ref.dtype)


def act_head_forward(embed, batch_video, w1, b1, w2, b2, num_videos, *,
                     tile_n=None, num_cores=2):
    """embed: [N, D] (f32/bf16), batch_video: [N] int in [0, num_videos).

    Returns [num_videos, C] f32 logits.  Ids outside [0, num_videos) are
    silently dropped (precondition; torch scatter semantics may differ).
    `num_cores=2` shards the node stream across both v7x TensorCores; on
    single-TC v5e/v6e it costs at most one extra (skipped) grid step.
    """
    n_rows, dim = embed.shape
    num_classes = w2.shape[1]
    itemsize = jnp.dtype(embed.dtype).itemsize

    if tile_n is None:
        tile_n = _choose_tile_n(n_rows, dim, itemsize)
    assert tile_n % 512 == 0, "tile_n must be a multiple of 512"

    num_tiles = -(-n_rows // tile_n)
    num_cores = max(1, min(num_cores, num_tiles))
    tiles_per_core = -(-num_tiles // num_cores)

    # Only the cheap int32 id vector is padded; embed streams straight from HBM
    # (no extra N*D HBM pass), with the ragged tail masked in-kernel.
    batch_video = batch_video.astype(jnp.int32)
    ids_len = num_tiles * tile_n
    if ids_len != n_rows:
        batch_video = jnp.pad(batch_video, (0, ids_len - n_rows),
                              constant_values=-1)
    batch_2d = batch_video.reshape(1, ids_len)

    pool_kernel = functools.partial(
        _segment_pool_kernel, num_videos=num_videos, num_tiles=num_tiles,
        tiles_per_core=tiles_per_core, tile_n=tile_n, n_rows=n_rows)

    def tile_index(c, k):
        # Clamp so surplus steps of the last slice stay in-bounds; their
        # contribution is skipped inside the kernel.
        return jnp.minimum(c * tiles_per_core + k, num_tiles - 1)

    # Scoped-VMEM budget: double-buffered embed tile (lanes padded to 128) plus
    # the sublane-padded id tile, with ~1.5x headroom, capped at 48 MiB so it is
    # safe under v7x's 64 MiB physical VMEM as well as v5e/v6e's 128 MiB.
    lane_padded_dim = -(-dim // 128) * 128
    stream_bytes = 2 * tile_n * lane_padded_dim * itemsize + 2 * 8 * tile_n * 4
    vmem_limit = int(min(max(1.5 * stream_bytes, 16 * 1024 * 1024),
                         48 * 1024 * 1024))

    pooled_parts, count_parts = pl.pallas_call(
        pool_kernel,
        out_shape=(
            jax.ShapeDtypeStruct((num_cores, num_videos, dim), jnp.float32),
            jax.ShapeDtypeStruct((num_cores, num_videos, 1), jnp.float32),
        ),
        grid_spec=pltpu.PrefetchScalarGridSpec(
            num_scalar_prefetch=0,
            grid=(num_cores, tiles_per_core),
            in_specs=[
                pl.BlockSpec((tile_n, dim), lambda c, k: (tile_index(c, k), 0)),
                pl.BlockSpec((1, tile_n), lambda c, k: (0, tile_index(c, k))),
            ],
            out_specs=[
                pl.BlockSpec((None, num_videos, dim), lambda c, k: (c, 0, 0)),
                pl.BlockSpec((None, num_videos, 1), lambda c, k: (c, 0, 0)),
            ],
        ),
        compiler_params=pltpu.CompilerParams(
            # Leading axis shards the node stream across TensorCores (v7x);
            # inner axis is the N reduction -> arbitrary.
            dimension_semantics=("parallel", "arbitrary"),
            vmem_limit_bytes=vmem_limit,
        ),
    )(embed, batch_2d)

    # Tiny epilogue: combine per-core partials, mean, fc1 + relu, fc2.  The fc
    # weights live only here (fetched once; no VMEM pressure on the stream).
    w1 = w1.astype(jnp.float32)
    w2 = w2.astype(jnp.float32)
    b1_2d = b1.reshape(1, dim).astype(jnp.float32)
    b2_2d = b2.reshape(1, num_classes).astype(jnp.float32)

    epilogue = functools.partial(_head_epilogue_kernel, num_cores=num_cores)

    return pl.pallas_call(
        epilogue,
        out_shape=jax.ShapeDtypeStruct((num_videos, num_classes), jnp.float32),
        grid_spec=pltpu.PrefetchScalarGridSpec(
            num_scalar_prefetch=0,
            grid=(1,),
            in_specs=[
                pl.BlockSpec((num_cores, num_videos, dim), lambda i: (0, 0, 0)),
                pl.BlockSpec((num_cores, num_videos, 1), lambda i: (0, 0, 0)),
                pl.BlockSpec((dim, dim), lambda i: (0, 0)),
                pl.BlockSpec((1, dim), lambda i: (0, 0)),
                pl.BlockSpec((dim, num_classes), lambda i: (0, 0)),
                pl.BlockSpec((1, num_classes), lambda i: (0, 0)),
            ],
            out_specs=pl.BlockSpec((num_videos, num_classes),
                                   lambda i: (0, 0)),
        ),
        compiler_params=pltpu.CompilerParams(
            dimension_semantics=("arbitrary",),
            vmem_limit_bytes=32 * 1024 * 1024,
        ),
    )(pooled_parts, count_parts, w1, b1_2d, w2, b2_2d)


def act_head_reference(embed, batch_video, w1, b1, w2, b2, num_videos):
    """Pure-JAX reference for correctness check (f32 compute)."""
    embed = embed.astype(jnp.float32)
    onehot = (jnp.arange(num_videos)[:, None] == batch_video[None, :]
              ).astype(jnp.float32)
    counts = jnp.maximum(onehot.sum(-1, keepdims=True), 1.0)
    pooled = (onehot @ embed) / counts
    h = jnp.maximum(pooled @ w1 + b1[None, :], 0.0)
    return h @ w2 + b2[None, :]


if __name__ == "__main__":
    # Small shapes consistent with the module.  N is not a multiple of the tile
    # size so the ragged-tail masking path is exercised; the explicit tile_n=512
    # run exercises multi-tile accumulation, the 2-slice "parallel" axis, and
    # the surplus-step skip.
    N = 1200          # number of node embeddings
    D = 32            # hidden dim
    C = 4             # num_classes
    B = 2             # number of videos (segments)

    key = jax.random.PRNGKey(0)
    k_embed, k_w1, k_b1, k_w2, k_b2 = jax.random.split(key, 5)

    embed = jax.random.normal(k_embed, (N, D), dtype=jnp.float32)
    # Deterministic segment assignment: first 500 nodes -> video 0, rest -> 1.
    batch_video = (jnp.arange(N) >= 500).astype(jnp.int32)

    # fc weights stored transposed (in_dim, out_dim) so kernels do x @ W + b.
    w1 = jax.random.normal(k_w1, (D, D), dtype=jnp.float32) * 0.1
    b1 = jax.random.normal(k_b1, (D,), dtype=jnp.float32) * 0.1
    w2 = jax.random.normal(k_w2, (D, C), dtype=jnp.float32) * 0.1
    b2 = jax.random.normal(k_b2, (C,), dtype=jnp.float32) * 0.1

    ref = act_head_reference(embed, batch_video, w1, b1, w2, b2, num_videos=B)

    # 1) f32, adaptive tile size (single big tile, single core slice).
    out = act_head_forward(embed, batch_video, w1, b1, w2, b2, num_videos=B)
    out = jax.block_until_ready(out)
    assert out.shape == (B, C), out.shape
    assert jnp.allclose(out, ref, atol=1e-4, rtol=1e-4), (out, ref)

    # 2) f32, forced small tiles: 3 tiles split over 2 core slices (one surplus
    #    step), ragged last tile.
    out_t = act_head_forward(embed, batch_video, w1, b1, w2, b2, num_videos=B,
                             tile_n=512, num_cores=2)
    out_t = jax.block_until_ready(out_t)
    assert jnp.allclose(out_t, ref, atol=1e-4, rtol=1e-4), (out_t, ref)

    # 3) bf16 embeddings (halves the dominant HBM stream); reference sees the
    #    same bf16-quantized values upcast to f32.
    embed_bf16 = embed.astype(jnp.bfloat16)
    out_bf = act_head_forward(embed_bf16, batch_video, w1, b1, w2, b2,
                              num_videos=B, tile_n=512, num_cores=2)
    out_bf = jax.block_until_ready(out_bf)
    ref_bf = act_head_reference(embed_bf16, batch_video, w1, b1, w2, b2,
                                num_videos=B)
    assert jnp.allclose(out_bf, ref_bf, atol=1e-2, rtol=1e-2), (out_bf, ref_bf)

    print("KERNEL_OK")
</pallas_src>

<mosaic_0001>
module attributes {stable_mosaic.version = 11 : i64} {
  func.func @_segment_pool_kernel(%arg0: i32, %arg1: i32, %arg2: memref<1536x32xf32, #tpu.memory_space<vmem>>, %arg3: memref<1x1536xi32, #tpu.memory_space<vmem>>, %arg4: memref<1x2x32xf32, #tpu.memory_space<vmem>>, %arg5: memref<1x2x1xf32, #tpu.memory_space<vmem>>) attributes {dimension_semantics = [#tpu.dimension_semantics<parallel>, #tpu.dimension_semantics<arbitrary>], iteration_bounds = array<i64: 1, 1>, scalar_prefetch = 0 : i64, scratch_operands = 0 : i64, tpu.core_type = #tpu.core_type<tc>, window_params = [{transform_indices = @transform_0, window_bounds = array<i64: 1536, 32>}, {transform_indices = @transform_1, window_bounds = array<i64: 1, 1536>}, {transform_indices = @transform_2, window_bounds = array<i64: 1, 2, 32>}, {transform_indices = @transform_3, window_bounds = array<i64: 1, 2, 1>}]} {
    %c0_i32 = arith.constant 0 : i32
    %0 = arith.cmpi eq, %arg1, %c0_i32 : i32
    %1 = arith.extui %0 : i1 to i32
    %c0_i32_0 = arith.constant 0 : i32
    %2 = arith.cmpi ne, %1, %c0_i32_0 : i32
    scf.if %2 {
      %cst = arith.constant 0.000000e+00 : f32
      %8 = vector.broadcast %cst : f32 to vector<2x32xf32>
      %c0 = arith.constant 0 : index
      %c0_3 = arith.constant 0 : index
      %c0_4 = arith.constant 0 : index
      %9 = vector.load %arg4[%c0, %c0_3, %c0_4] : memref<1x2x32xf32, #tpu.memory_space<vmem>>, vector<1x2x32xf32>
      %10 = vector.shape_cast %9 : vector<1x2x32xf32> to vector<2x32xf32>
      %11 = vector.shape_cast %8 : vector<2x32xf32> to vector<1x2x32xf32>
      tpu.vector_store %arg4[%c0, %c0_3, %c0_4], %11 {strides = array<i32>} : memref<1x2x32xf32, #tpu.memory_space<vmem>>, vector<1x2x32xf32>,
      %cst_5 = arith.constant 0.000000e+00 : f32
      %12 = vector.broadcast %cst_5 : f32 to vector<2x1xf32>
      %c0_6 = arith.constant 0 : index
      %c0_7 = arith.constant 0 : index
      %c0_8 = arith.constant 0 : index
      %13 = vector.load %arg5[%c0_6, %c0_7, %c0_8] : memref<1x2x1xf32, #tpu.memory_space<vmem>>, vector<1x2x1xf32>
      %14 = vector.shape_cast %13 : vector<1x2x1xf32> to vector<2x1xf32>
      %15 = vector.shape_cast %12 : vector<2x1xf32> to vector<1x2x1xf32>
      tpu.vector_store %arg5[%c0_6, %c0_7, %c0_8], %15 {strides = array<i32>} : memref<1x2x1xf32, #tpu.memory_space<vmem>>, vector<1x2x1xf32>,
    } else {
    }
    %c1_i32 = arith.constant 1 : i32
    %3 = arith.muli %arg0, %c1_i32 : i32
    %4 = arith.addi %3, %arg1 : i32
    %c1_i32_1 = arith.constant 1 : i32
    %5 = arith.cmpi slt, %4, %c1_i32_1 : i32
    %6 = arith.extui %5 : i1 to i32
    %c0_i32_2 = arith.constant 0 : i32
    %7 = arith.cmpi ne, %6, %c0_i32_2 : i32
    scf.if %7 {
      %c0 = arith.constant 0 : index
      %c0_3 = arith.constant 0 : index
      %8 = vector.load %arg3[%c0, %c0_3] : memref<1x1536xi32, #tpu.memory_space<vmem>>, vector<1x1536xi32>
      %9 = tpu.iota {dimensions = array<i32: 0>} : vector<2x1536xi32>
      %10 = vector.broadcast %8 : vector<1x1536xi32> to vector<2x1536xi32>
      %11 = arith.cmpi eq, %9, %10 : vector<2x1536xi32>
      %c0_4 = arith.constant 0 : index
      %c0_5 = arith.constant 0 : index
      %12 = vector.load %arg2[%c0_4, %c0_5] : memref<1536x32xf32, #tpu.memory_space<vmem>>, vector<1536x32xf32>
      %c1536_i32 = arith.constant 1536 : i32
      %13 = arith.muli %4, %c1536_i32 : i32
      %14 = tpu.iota {dimensions = array<i32: 0>} : vector<1536x1xi32>
      %15 = vector.broadcast %13 : i32 to vector<1536x1xi32>
      %16 = arith.addi %15, %14 : vector<1536x1xi32>
      %c1200_i32 = arith.constant 1200 : i32
      %17 = vector.broadcast %c1200_i32 : i32 to vector<1536x1xi32>
      %18 = arith.cmpi slt, %16, %17 : vector<1536x1xi32>
      %cst = arith.constant 0.000000e+00 : f32
      %19 = vector.broadcast %cst : f32 to vector<1536x32xf32>
      %20 = vector.shape_cast %18 : vector<1536x1xi1> to vector<1536x1xi1>
      %21 = vector.broadcast %20 : vector<1536x1xi1> to vector<1536x32xi1>
      %22 = arith.select %21, %12, %19 : vector<1536x32xi1>, vector<1536x32xf32>
      %c0_6 = arith.constant 0 : index
      %c0_7 = arith.constant 0 : index
      %c0_8 = arith.constant 0 : index
      %23 = vector.load %arg5[%c0_6, %c0_7, %c0_8] : memref<1x2x1xf32, #tpu.memory_space<vmem>>, vector<1x2x1xf32>
      %24 = vector.shape_cast %23 : vector<1x2x1xf32> to vector<2x1xf32>
      %25 = arith.extui %11 : vector<2x1536xi1> to vector<2x1536xi32>
      %26 = arith.sitofp %25 : vector<2x1536xi32> to vector<2x1536xf32>
      %cst_9 = arith.constant dense<0.000000e+00> : vector<2xf32>
      %27 = vector.multi_reduction <add>, %26, %cst_9 [1] : vector<2x1536xf32> to vector<2xf32>
      %28 = vector.shape_cast %27 : vector<2xf32> to vector<2x1xf32>
      %29 = arith.addf %24, %28 : vector<2x1xf32>
      %c0_10 = arith.constant 0 : index
      %c0_11 = arith.constant 0 : index
      %c0_12 = arith.constant 0 : index
      %30 = vector.load %arg5[%c0_10, %c0_11, %c0_12] : memref<1x2x1xf32, #tpu.memory_space<vmem>>, vector<1x2x1xf32>
      %31 = vector.shape_cast %30 : vector<1x2x1xf32> to vector<2x1xf32>
      %32 = vector.shape_cast %29 : vector<2x1xf32> to vector<1x2x1xf32>
      tpu.vector_store %arg5[%c0_10, %c0_11, %c0_12], %32 {strides = array<i32>} : memref<1x2x1xf32, #tpu.memory_space<vmem>>, vector<1x2x1xf32>,
      %c0_13 = arith.constant 0 : index
      %c0_14 = arith.constant 0 : index
      %c0_15 = arith.constant 0 : index
      %33 = vector.load %arg4[%c0_13, %c0_14, %c0_15] : memref<1x2x32xf32, #tpu.memory_space<vmem>>, vector<1x2x32xf32>
      %34 = vector.shape_cast %33 : vector<1x2x32xf32> to vector<2x32xf32>
      %35 = arith.extui %11 : vector<2x1536xi1> to vector<2x1536xi32>
      %36 = arith.sitofp %35 : vector<2x1536xi32> to vector<2x1536xf32>
      %cst_16 = arith.constant dense<0.000000e+00> : vector<2x32xf32>
      %37 = tpu.matmul %36, %22, %cst_16 {dimension_numbers = #tpu.dot_dimension_numbers<[1], [0], [0], [1], [0, 0, 1, 1], [], []>} : vector<2x1536xf32>, vector<1536x32xf32>, vector<2x32xf32> -> vector<2x32xf32>
      %38 = arith.addf %34, %37 : vector<2x32xf32>
      %c0_17 = arith.constant 0 : index
      %c0_18 = arith.constant 0 : index
      %c0_19 = arith.constant 0 : index
      %39 = vector.load %arg4[%c0_17, %c0_18, %c0_19] : memref<1x2x32xf32, #tpu.memory_space<vmem>>, vector<1x2x32xf32>
      %40 = vector.shape_cast %39 : vector<1x2x32xf32> to vector<2x32xf32>
      %41 = vector.shape_cast %38 : vector<2x32xf32> to vector<1x2x32xf32>
      tpu.vector_store %arg4[%c0_17, %c0_18, %c0_19], %41 {strides = array<i32>} : memref<1x2x32xf32, #tpu.memory_space<vmem>>, vector<1x2x32xf32>,
    } else {
    }
    return
  }
  func.func @transform_0(%arg0: i32, %arg1: i32) -> (i32, i32) {
    %c1_i32 = arith.constant 1 : i32
    %0 = arith.muli %arg0, %c1_i32 : i32
    %1 = arith.addi %0, %arg1 : i32
    %c0_i32 = arith.constant 0 : i32
    %2 = arith.minsi %1, %c0_i32 : i32
    %c0_i32_0 = arith.constant 0 : i32
    %c0_i32_1 = arith.constant 0 : i32
    return %2, %c0_i32_0 : i32, i32
  }
  func.func @transform_1(%arg0: i32, %arg1: i32) -> (i32, i32) {
    %c1_i32 = arith.constant 1 : i32
    %0 = arith.muli %arg0, %c1_i32 : i32
    %1 = arith.addi %0, %arg1 : i32
    %c0_i32 = arith.constant 0 : i32
    %2 = arith.minsi %1, %c0_i32 : i32
    %c0_i32_0 = arith.constant 0 : i32
    %c0_i32_1 = arith.constant 0 : i32
    return %c0_i32_0, %2 : i32, i32
  }
  func.func @transform_2(%arg0: i32, %arg1: i32) -> (i32, i32, i32) {
    %c0_i32 = arith.constant 0 : i32
    %c0_i32_0 = arith.constant 0 : i32
    %c0_i32_1 = arith.constant 0 : i32
    return %arg0, %c0_i32, %c0_i32_0 : i32, i32, i32
  }
  func.func @transform_3(%arg0: i32, %arg1: i32) -> (i32, i32, i32) {
    %c0_i32 = arith.constant 0 : i32
    %c0_i32_0 = arith.constant 0 : i32
    %c0_i32_1 = arith.constant 0 : i32
    return %arg0, %c0_i32, %c0_i32_0 : i32, i32, i32
  }
}

</mosaic_0001>

<bundles_post_ra>
// kernel: tpu_custom_call.1
= control target key start
LH: loop header
LB: loop body
LE: loop exit
PB: predicated region body
PF: predicated region fallthrough
CT: control target
= control target key end

     0   :  { %vm1496_vm0 = vcmask 1041408   ;;  %s2504_s0 = inlined_call_operand.vmem [shape: f32[1200,32], index: 0, kind: input, shape index: {}]   ;;  %s2505_s1 = inlined_call_operand.vmem [shape: s32[1,1536], index: 1, kind: input, shape index: {}]   ;;  %s2506_s2 = inlined_call_operand.hbm [shape: f32[1,2,32], index: 2, kind: output, shape index: {0}]   ;;  %s2507_s3 = inlined_call_operand.vmem [shape: f32[1,2,1], index: 3, kind: output, shape index: {1}]  }
   0x1   :  { %v141_v0 = vld [vmem:[%s2504_s0 + $0x78] sm:$0xff]  ;;  %v140_v1 = vld [vmem:[%s2504_s0 + $0x70] sm:$0xff]  ;;  %v139_v4 = vld [vmem:[%s2504_s0 + $0x68] sm:$0xff] }
   0x2   :  { %1526 = vmatpush.msra.mxu0 %v141_v0  ;;  %v173_v2 = vld [vmem:[%s2504_s0 + $0x178] sm:$0xff]  ;;  %v172_v3 = vld [vmem:[%s2504_s0 + $0x170] sm:$0xff]  ;;  %v171_v7 = vld [vmem:[%s2504_s0 + $0x168] sm:$0xff] }
   0x3   :  { %1566 = vmatpush.msra.mxu2 %v173_v2  ;;  %v189_v5 = vld [vmem:[%s2504_s0 + $0x1f8] sm:$0xff]  ;;  %v188_v8 = vld [vmem:[%s2504_s0 + $0x1f0] sm:$0xff]  ;;  %v138_v9 = vld [vmem:[%s2504_s0 + $0x60] sm:$0xff] }
   0x4   :  { %v157_v6 = vld [vmem:[%s2504_s0 + $0xf8] sm:$0xff]  ;;  %1527 = vmatpush.msra.mxu0 %v140_v1  ;;  %1586 = vmatpush.msra.mxu3 %v189_v5  ;;  %v156_v10 = vld [vmem:[%s2504_s0 + $0xf0] sm:$0xff]  ;;  %v187_v11 = vld [vmem:[%s2504_s0 + $0x1e8] sm:$0xff] }
   0x5   :  { %1567 = vmatpush.msra.mxu2 %v172_v3  ;;  %1546 = vmatpush.msra.mxu1 %v157_v6  ;;  %v170_v12 = vld [vmem:[%s2504_s0 + $0x160] sm:$0xff]  ;;  %v155_v13 = vld [vmem:[%s2504_s0 + $0xe8] sm:$0xff]  ;;  %v137_v14 = vld [vmem:[%s2504_s0 + $0x58] sm:$0xff] }
   0x6   :  { %1528 = vmatpush.msra.mxu0 %v139_v4  ;;  %1587 = vmatpush.msra.mxu3 %v188_v8  ;;  %v186_v15 = vld [vmem:[%s2504_s0 + $0x1e0] sm:$0xff]  ;;  %v169_v16 = vld [vmem:[%s2504_s0 + $0x158] sm:$0xff]  ;;  %v136_v18 = vld [vmem:[%s2504_s0 + $0x50] sm:$0xff]  ;;  %v100_v4 = vlaneseq }
   0x7   :  { %1568 = vmatpush.msra.mxu2 %v171_v7  ;;  %1547 = vmatpush.msra.mxu1 %v156_v10  ;;  %v154_v17 = vld [vmem:[%s2504_s0 + $0xe0] sm:$0xff]  ;;  %v185_v19 = vld [vmem:[%s2504_s0 + $0x1d8] sm:$0xff]  ;;  %v168_v20 = vld [vmem:[%s2504_s0 + $0x150] sm:$0xff] }
   0x8   :  { %1529 = vmatpush.msra.mxu0 %v138_v9  ;;  %1588 = vmatpush.msra.mxu3 %v187_v11  ;;  %v153_v21 = vld [vmem:[%s2504_s0 + $0xd8] sm:$0xff]  ;;  %v135_v22 = vld [vmem:[%s2504_s0 + $0x48] sm:$0xff]  ;;  %v184_v23 = vld [vmem:[%s2504_s0 + $0x1d0] sm:$0xff] }
   0x9   :  { %1569 = vmatpush.msra.mxu2 %v170_v12  ;;  %1548 = vmatpush.msra.mxu1 %v155_v13  ;;  %v167_v24 = vld [vmem:[%s2504_s0 + $0x148] sm:$0xff]  ;;  %v152_v25 = vld [vmem:[%s2504_s0 + $0xd0] sm:$0xff]  ;;  %v134_v26 = vld [vmem:[%s2504_s0 + $0x40] sm:$0xff]  ;;  %v2102_v13 = vshrl.u32 %v100_v4, 7 }
   0xa   :  { %1530 = vmatpush.msra.mxu0 %v137_v14  ;;  %1589 = vmatpush.msra.mxu3 %v186_v15  ;;  %v183_v27 = vld [vmem:[%s2504_s0 + $0x1c8] sm:$0xff]  ;;  %v166_v28 = vld [vmem:[%s2504_s0 + $0x140] sm:$0xff]  ;;  %v133_v30 = vld [vmem:[%s2504_s0 + $0x38] sm:$0xff] }
   0xb   :  { %1570 = vmatpush.msra.mxu2 %v169_v16  ;;  %1549 = vmatpush.msra.mxu1 %v154_v17  ;;  %v151_v29 = vld [vmem:[%s2504_s0 + $0xc8] sm:$0xff]  ;;  %v182_v31 = vld [vmem:[%s2504_s0 + $0x1c0] sm:$0xff]  ;;  %v165_v32 = vld [vmem:[%s2504_s0 + $0x138] sm:$0xff] }
   0xc   :  { %1531 = vmatpush.msra.mxu0 %v136_v18  ;;  %1590 = vmatpush.msra.mxu3 %v185_v19  ;;  %v150_v33 = vld [vmem:[%s2504_s0 + $0xc0] sm:$0xff]  ;;  %v132_v34 = vld [vmem:[%s2504_s0 + $0x30] sm:$0xff]  ;;  %v181_v35 = vld [vmem:[%s2504_s0 + $0x1b8] sm:$0xff] }
   0xd   :  { %1571 = vmatpush.msra.mxu2 %v168_v20  ;;  %1550 = vmatpush.msra.mxu1 %v153_v21  ;;  %v164_v36 = vld [vmem:[%s2504_s0 + $0x130] sm:$0xff]  ;;  %v149_v37 = vld [vmem:[%s2504_s0 + $0xb8] sm:$0xff]  ;;  %v131_v38 = vld [vmem:[%s2504_s0 + $0x28] sm:$0xff] }
   0xe   :  { %1532 = vmatpush.msra.mxu0 %v135_v22  ;;  %1591 = vmatpush.msra.mxu3 %v184_v23  ;;  %v180_v39 = vld [vmem:[%s2504_s0 + $0x1b0] sm:$0xff]  ;;  %v163_v40 = vld [vmem:[%s2504_s0 + $0x128] sm:$0xff]  ;;  %v130_v42 = vld [vmem:[%s2504_s0 + $0x20] sm:$0xff] }
   0xf   :  { %1572 = vmatpush.msra.mxu2 %v167_v24  ;;  %1551 = vmatpush.msra.mxu1 %v152_v25  ;;  %v148_v41 = vld [vmem:[%s2504_s0 + $0xb0] sm:$0xff]  ;;  %v179_v43 = vld [vmem:[%s2504_s0 + $0x1a8] sm:$0xff]  ;;  %v162_v44 = vld [vmem:[%s2504_s0 + $0x120] sm:$0xff] }
  0x10   :  { %1533 = vmatpush.msra.mxu0 %v134_v26  ;;  %1592 = vmatpush.msra.mxu3 %v183_v27  ;;  %v147_v45 = vld [vmem:[%s2504_s0 + $0xa8] sm:$0xff]  ;;  %v129_v46 = vld [vmem:[%s2504_s0 + $0x18] sm:$0xff]  ;;  %v178_v47 = vld [vmem:[%s2504_s0 + $0x1a0] sm:$0xff] }
  0x11   :  { %1573 = vmatpush.msra.mxu2 %v166_v28  ;;  %1552 = vmatpush.msra.mxu1 %v151_v29  ;;  %v161_v48 = vld [vmem:[%s2504_s0 + $0x118] sm:$0xff]  ;;  %v146_v49 = vld [vmem:[%s2504_s0 + $0xa0] sm:$0xff]  ;;  %v128_v50 = vld [vmem:[%s2504_s0 + $0x10] sm:$0xff] }
  0x12   :  { %1534 = vmatpush.msra.mxu0 %v133_v30  ;;  %1593 = vmatpush.msra.mxu3 %v182_v31  ;;  %v177_v51 = vld [vmem:[%s2504_s0 + $0x198] sm:$0xff]  ;;  %v160_v52 = vld [vmem:[%s2504_s0 + $0x110] sm:$0xff]  ;;  %v127_v54 = vld [vmem:[%s2504_s0 + $0x8] sm:$0xff] }
  0x13   :  { %1574 = vmatpush.msra.mxu2 %v165_v32  ;;  %1553 = vmatpush.msra.mxu1 %v150_v33  ;;  %v145_v53 = vld [vmem:[%s2504_s0 + $0x98] sm:$0xff]  ;;  %v176_v55 = vld [vmem:[%s2504_s0 + $0x190] sm:$0xff]  ;;  %v159_v56 = vld [vmem:[%s2504_s0 + $0x108] sm:$0xff]  ;;  %v1851_v32 = vmov 0.0  }
  0x14   :  { %1535 = vmatpush.msra.mxu0 %v132_v34  ;;  %1594 = vmatpush.msra.mxu3 %v181_v35  ;;  %v144_v57 = vld [vmem:[%s2504_s0 + $0x90] sm:$0xff]  ;;  %v126_v58 = vld [vmem:[%s2504_s0] sm:$0xff]  ;;  %v175_v59 = vld [vmem:[%s2504_s0 + $0x188] sm:$0xff] }
  0x15   :  { %1575 = vmatpush.msra.mxu2 %v164_v36  ;;  %1554 = vmatpush.msra.mxu1 %v149_v37  ;;  %v205_v60 = vld [vmem:[%s2504_s0 + $0x278] sm:$0xff]  ;;  %v158_v61 = vld [vmem:[%s2504_s0 + $0x100] sm:$0xff]  ;;  %v143_v63 = vld [vmem:[%s2504_s0 + $0x88] sm:$0xff] }
  0x16   :  { %1536 = vmatpush.msra.mxu0 %v131_v38  ;;  %1595 = vmatpush.msra.mxu3 %v180_v39  ;;  %v237_v62 = vld [vmem:[%s2504_s0 + $0x378] sm:$0xff]  ;;  %v204_v0 = vld [vmem:[%s2504_s0 + $0x270] sm:$0xff]  ;;  %v174_v1 = vld [vmem:[%s2504_s0 + $0x180] sm:$0xff] }
  0x17   :  { %1576 = vmatpush.msra.mxu2 %v163_v40  ;;  %1555 = vmatpush.msra.mxu1 %v148_v41  ;;  %v236_v2 = vld [vmem:[%s2504_s0 + $0x370] sm:$0xff]  ;;  %v253_v3 = vld [vmem:[%s2504_s0 + $0x3f8] sm:$0xff]  ;;  %v203_v5 = vld [vmem:[%s2504_s0 + $0x268] sm:$0xff] }
  0x18   :  { %1537 = vmatpush.msra.mxu0 %v130_v42  ;;  %1596 = vmatpush.msra.mxu3 %v179_v43  ;;  %v142_v6 = vld [vmem:[%s2504_s0 + $0x80] sm:$0xff]  ;;  %v221_v7 = vld [vmem:[%s2504_s0 + $0x2f8] sm:$0xff]  ;;  %v235_v8 = vld [vmem:[%s2504_s0 + $0x368] sm:$0xff] }
  0x19   :  { %1577 = vmatpush.msra.mxu2 %v162_v44  ;;  %1556 = vmatpush.msra.mxu1 %v147_v45  ;;  %v202_v9 = vld [vmem:[%s2504_s0 + $0x260] sm:$0xff]  ;;  %v252_v10 = vld [vmem:[%s2504_s0 + $0x3f0] sm:$0xff]  ;;  %v201_v14 = vld [vmem:[%s2504_s0 + $0x258] sm:$0xff] }
  0x1a   :  { %1538 = vmatpush.msra.mxu0 %v129_v46  ;;  %1597 = vmatpush.msra.mxu3 %v178_v47  ;;  %v220_v11 = vld [vmem:[%s2504_s0 + $0x2f0] sm:$0xff]  ;;  %v234_v12 = vld [vmem:[%s2504_s0 + $0x360] sm:$0xff]  ;;  %v251_v15 = vld [vmem:[%s2504_s0 + $0x3e8] sm:$0xff] }
  0x1b   :  { %1578 = vmatpush.msra.mxu2 %v161_v48  ;;  %1557 = vmatpush.msra.mxu1 %v146_v49  ;;  %v2113_v16 = vld [vmem:[%s2505_s1] sm:$0xff]  ;;  %v219_v17 = vld [vmem:[%s2504_s0 + $0x2e8] sm:$0xff]  ;;  %v233_v18 = vld [vmem:[%s2504_s0 + $0x358] sm:$0xff] }
  0x1c   :  { %1539 = vmatpush.msra.mxu0 %v128_v50  ;;  %1598 = vmatpush.msra.mxu3 %v177_v51  ;;  %v104_v19 = vperm.slane %v2113_v16, 2  ;;  %v102_v20 = vperm.slane %v2113_v16, 0  ;;  %v105_v21 = vperm.slane %v2113_v16, 3  ;;  %v200_v22 = vld [vmem:[%s2504_s0 + $0x250] sm:$0xff]  ;;  %v250_v23 = vld [vmem:[%s2504_s0 + $0x3e0] sm:$0xff]  ;;  %v103_v24 = vperm.slane %v2113_v16, 1 }
  0x1d   :  { %1579 = vmatpush.msra.mxu2 %v160_v52  ;;  %1558 = vmatpush.msra.mxu1 %v145_v53  ;;  %v218_v25 = vld [vmem:[%s2504_s0 + $0x2e0] sm:$0xff]  ;;  %v232_v26 = vld [vmem:[%s2504_s0 + $0x350] sm:$0xff]  ;;  %v106_v29 = vperm.slane %v2113_v16, 4  ;;  %v199_v30 = vld [vmem:[%s2504_s0 + $0x248] sm:$0xff] }
  0x1e   :  { %1540 = vmatpush.msra.mxu0 %v127_v54  ;;  %1599 = vmatpush.msra.mxu3 %v176_v55  ;;  %vm2138_vm1 = vcmp.eq.s32.totalorder %v2102_v13, %v104_v19  ;;  %vm2143_vm2 = vcmp.eq.s32.totalorder %v2102_v13, %v102_v20  ;;  %v249_v31 = vld [vmem:[%s2504_s0 + $0x3d8] sm:$0xff]  ;;  %vm2161_vm3 = vcmp.eq.s32.totalorder %v2102_v13, %v105_v21  ;;  %v231_v38 = vld [vmem:[%s2504_s0 + $0x348] sm:$0xff]  ;;  %v198_v42 = vld [vmem:[%s2504_s0 + $0x240] sm:$0xff]  ;;  %v107_v54 = vperm.slane %v2113_v16, 5 }
  0x1f   :  { %1580 = vmatpush.msra.mxu2 %v159_v56  ;;  %1559 = vmatpush.msra.mxu1 %v144_v57  ;;  %v1800_v33 = vsel %vm2138_vm1, 1.0, %v1851_v32  ;;  %v1798_v34 = vsel %vm2143_vm2, 1.0, %v1851_v32  ;;  %vm2166_vm4 = vcmp.eq.s32.totalorder %v2102_v13, %v103_v24  ;;  %v217_v37 = vld [vmem:[%s2504_s0 + $0x2d8] sm:$0xff]  ;;  %v1801_v40 = vsel %vm2161_vm3, 1.0, %v1851_v32  ;;  %v248_v43 = vld [vmem:[%s2504_s0 + $0x3d0] sm:$0xff]  ;;  %v230_v47 = vld [vmem:[%s2504_s0 + $0x340] sm:$0xff] }
  0x20   :  { %1541 = vmatpush.msra.mxu0 %v126_v58  ;;  %1600 = vmatpush.msra.mxu3 %v175_v59  ;;  %v1497_v39 = vsel %vm1496_vm0, %v1798_v34, 0.0  ;;  %v1799_v41 = vsel %vm2166_vm4, 1.0, %v1851_v32  ;;  %v1500_v44 = vsel %vm1496_vm0, %v1800_v33, 0.0  ;;  %v216_v46 = vld [vmem:[%s2504_s0 + $0x2d0] sm:$0xff]  ;;  %vm2198_vm5 = vcmp.eq.s32.totalorder %v2102_v13, %v106_v29  ;;  %v197_v50 = vld [vmem:[%s2504_s0 + $0x238] sm:$0xff]  ;;  %v247_v51 = vld [vmem:[%s2504_s0 + $0x3c8] sm:$0xff] }
  0x21   :  { %1581 = vmatpush.msra.mxu2 %v158_v61  ;;  %1560 = vmatpush.msra.mxu1 %v143_v63  ;;  %v1498_v45 = vsel %vm1496_vm0, %v1799_v41, 0.0  ;;  %v1502_v52 = vsel %vm1496_vm0, %v1801_v40, 0.0  ;;  %v1802_v53 = vsel %vm2198_vm5, 1.0, %v1851_v32  ;;  %v215_v55 = vld [vmem:[%s2504_s0 + $0x2c8] sm:$0xff]  ;;  %v229_v56 = vld [vmem:[%s2504_s0 + $0x338] sm:$0xff] }
  0x22   :  { %1606 = vmatpush.msrb.mxu0 %v205_v60  ;;  %1601 = vmatpush.msra.mxu3 %v174_v1  ;;  %v1499_v48 = vadd.f32 %v1498_v45, %v1497_v39 }
  0x23   :  { %1646 = vmatpush.msrb.mxu2 %v237_v62  ;;  %1561 = vmatpush.msra.mxu1 %v142_v6 }
  0x24   :  { %1607 = vmatpush.msrb.mxu0 %v204_v0  ;;  %1666 = vmatpush.msrb.mxu3 %v253_v3  ;;  %v1501_v57 = vadd.f32 %v1500_v44, %v1499_v48 }
  0x25   :  { %1647 = vmatpush.msrb.mxu2 %v236_v2  ;;  %1626 = vmatpush.msrb.mxu1 %v221_v7 }
  0x26   :  { %1608 = vmatpush.msrb.mxu0 %v203_v5  ;;  %1667 = vmatpush.msrb.mxu3 %v252_v10 }
  0x27   :  { %1648 = vmatpush.msrb.mxu2 %v235_v8  ;;  %1627 = vmatpush.msrb.mxu1 %v220_v11 }
  0x28   :  { %1609 = vmatpush.msrb.mxu0 %v202_v9  ;;  %1668 = vmatpush.msrb.mxu3 %v251_v15 }
  0x29   :  { %1649 = vmatpush.msrb.mxu2 %v234_v12  ;;  %1628 = vmatpush.msrb.mxu1 %v219_v17 }
  0x2a   :  { %1610 = vmatpush.msrb.mxu0 %v201_v14  ;;  %1669 = vmatpush.msrb.mxu3 %v250_v23 }
  0x2b   :  { %1650 = vmatpush.msrb.mxu2 %v233_v18  ;;  %1629 = vmatpush.msrb.mxu1 %v218_v25 }
  0x2c   :  { %1611 = vmatpush.msrb.mxu0 %v200_v22  ;;  %1670 = vmatpush.msrb.mxu3 %v249_v31 }
  0x2d   :  { %1651 = vmatpush.msrb.mxu2 %v232_v26  ;;  %1630 = vmatpush.msrb.mxu1 %v217_v37 }
  0x2e   :  { %1612 = vmatpush.msrb.mxu0 %v199_v30  ;;  %1671 = vmatpush.msrb.mxu3 %v248_v43 }
  0x2f   :  { %1652 = vmatpush.msrb.mxu2 %v231_v38 }
  0x30   :  { %1613 = vmatpush.msrb.mxu0 %v198_v42 }
  0x31   :  { %9 = vsyncpa [#allocation3], 0  ;;  %v196_v58 = vld [vmem:[%s2504_s0 + $0x230] sm:$0xff]  ;;  %1631 = vmatpush.msrb.mxu1 %v216_v46  ;;  %1653 = vmatpush.msrb.mxu2 %v230_v47  ;;  %v246_v59 = vld [vmem:[%s2504_s0 + $0x3c0] sm:$0xff]  ;;  %v1503_v62 = vadd.f32 %v1502_v52, %v1501_v57  ;;  %v108_v63 = vperm.slane %v2113_v16, 6  ;;  %v1504_v0 = vsel %vm1496_vm0, %v1802_v53, 0.0  ;;  %vm2234_vm6 = vcmp.eq.s32.totalorder %v2102_v13, %v107_v54 }
  0x32   :  { %1614 = vmatpush.msrb.mxu0 %v197_v50  ;;  %1672 = vmatpush.msrb.mxu3 %v247_v51  ;;  %v214_v60 = vld [vmem:[%s2504_s0 + $0x2c0] sm:$0xff]  ;;  %v228_v61 = vld [vmem:[%s2504_s0 + $0x330] sm:$0xff]  ;;  %v195_v2 = vld [vmem:[%s2504_s0 + $0x228] sm:$0xff]  ;;  %v1803_v4 = vsel %vm2234_vm6, 1.0, %v1851_v32  ;;  %v109_v14 = vperm.slane %v2113_v16, 7  ;;  %v1852_v26 = vmov 1.0  }
  0x33   :  { %1632 = vmatpush.msrb.mxu1 %v215_v55  ;;  %1654 = vmatpush.msrb.mxu2 %v229_v56  ;;  %v245_v3 = vld [vmem:[%s2504_s0 + $0x3b8] sm:$0xff]  ;;  %v227_v6 = vld [vmem:[%s2504_s0 + $0x328] sm:$0xff]  ;;  %v194_v7 = vld [vmem:[%s2504_s0 + $0x220] sm:$0xff]  ;;  %v1505_v9 = vadd.f32 %v1504_v0, %v1503_v62  ;;  %vm2266_vm7 = vcmp.eq.s32.totalorder %v2102_v13, %v108_v63  ;;  %v1506_v15 = vsel %vm1496_vm0, %v1803_v4, 0.0  ;;  %vm89_vm13 = vcmask 254976   ;;  %s1853_s21 = smov [#allocation2]  }
  0x34   :  { %1615 = vmatpush.msrb.mxu0 %v196_v58  ;;  %1673 = vmatpush.msrb.mxu3 %v246_v59  ;;  %v213_v5 = vld [vmem:[%s2504_s0 + $0x2b8] sm:$0xff]  ;;  %v244_v8 = vld [vmem:[%s2504_s0 + $0x3b0] sm:$0xff]  ;;  %v226_v11 = vld [vmem:[%s2504_s0 + $0x320] sm:$0xff]  ;;  %v1804_v19 = vsel %vm2266_vm7, 1.0, %v1851_v32  ;;  %vm2295_vm8 = vcmp.eq.s32.totalorder %v2102_v13, %v109_v14  ;;  %90 = vst.msk [vmem:[#allocation2] sm:$0x3] %vm89_vm13, %v1851_v32 }
  0x35   :  { %1633 = vmatpush.msrb.mxu1 %v214_v60  ;;  %1655 = vmatpush.msrb.mxu2 %v228_v61  ;;  %v212_v10 = vld [vmem:[%s2504_s0 + $0x2b0] sm:$0xff]  ;;  %v193_v17 = vld [vmem:[%s2504_s0 + $0x218] sm:$0xff]  ;;  %v243_v18 = vld [vmem:[%s2504_s0 + $0x3a8] sm:$0xff]  ;;  %v1507_v22 = vadd.f32 %v1506_v15, %v1505_v9  ;;  %v1508_v24 = vsel %vm1496_vm0, %v1804_v19, 0.0  ;;  %v1805_v30 = vsel %vm2295_vm8, 1.0, %v1851_v32  ;;  %vm91_vm14 = vcmask 1024  }
  0x36   :  { %1616 = vmatpush.msrb.mxu0 %v195_v2  ;;  %1674 = vmatpush.msrb.mxu3 %v245_v3  ;;  %v211_v16 = vld [vmem:[%s2504_s0 + $0x2a8] sm:$0xff]  ;;  %v192_v20 = vld [vmem:[%s2504_s0 + $0x210] sm:$0xff]  ;;  %v225_v21 = vld [vmem:[%s2504_s0 + $0x318] sm:$0xff]  ;;  %v1510_v28 = vsel %vm1496_vm0, %v1805_v30, 0.0  ;;  %92 = vst.msk [vmem:[%s2507_s3] sm:$0x3] %vm91_vm14, %v1851_v32 }
  0x37   :  { %1634 = vmatpush.msrb.mxu1 %v213_v5  ;;  %1656 = vmatpush.msrb.mxu2 %v227_v6  ;;  %v242_v23 = vld [vmem:[%s2504_s0 + $0x3a0] sm:$0xff]  ;;  %v191_v29 = vld [vmem:[%s2504_s0 + $0x208] sm:$0xff]  ;;  %v224_v33 = vld [vmem:[%s2504_s0 + $0x310] sm:$0xff]  ;;  %v1509_v39 = vadd.f32 %v1508_v24, %v1507_v22  ;;  %s1774_s22 = sshll.u32 %s1853_s21, 4  ;;  %s1776_s24 = sshll.u32 %s2506_s2, 4  ;;  %s1775_s22 = int_to_ptr.vmem [resolvable:$true] %s1774_s22  ;;  %s1777_s24 = int_to_ptr.hbm [resolvable:$true] %s1776_s24 }
  0x38   :  { %1617 = vmatpush.msrb.mxu0 %v194_v7  ;;  %1675 = vmatpush.msrb.mxu3 %v244_v8  ;;  %v99_v31 = vld [vmem:[%s2505_s1 + $0x8] sm:$0xf]  ;;  %v210_v27 = vld [vmem:[%s2504_s0 + $0x2a0] sm:$0xff]  ;;  %v241_v38 = vld [vmem:[%s2504_s0 + $0x398] sm:$0xff] }
  0x39   :  { %1635 = vmatpush.msrb.mxu1 %v212_v10  ;;  %1657 = vmatpush.msrb.mxu2 %v226_v11  ;;  %v112_v34 = vperm.slane %v99_v31, 2  ;;  %v190_v37 = vld [vmem:[%s2504_s0 + $0x200] sm:$0xff]  ;;  %v269_v40 = vld [vmem:[%s2504_s0 + $0x478] sm:$0xff]  ;;  %v110_v41 = vperm.slane %v99_v31, 0  ;;  %v113_v42 = vperm.slane %v99_v31, 3  ;;  %v223_v44 = vld [vmem:[%s2504_s0 + $0x308] sm:$0xff]  ;;  %v1511_v54 = vadd.f32 %v1510_v28, %v1509_v39 }
  0x3a   :  { %1618 = vmatpush.msrb.mxu0 %v193_v17  ;;  %1676 = vmatpush.msrb.mxu3 %v243_v18  ;;  %v209_v43 = vld [vmem:[%s2504_s0 + $0x298] sm:$0xff]  ;;  %v240_v35 = vld [vmem:[%s2504_s0 + $0x390] sm:$0xff]  ;;  %v111_v48 = vperm.slane %v99_v31, 1  ;;  %v222_v51 = vld [vmem:[%s2504_s0 + $0x300] sm:$0xff] }
  0x3b   :  { %1812 = vmatmul.msk.f32.vlgmr.msra.gmra.mxu2 %vm2138_vm1, %v1852_v26  ;;  %1636 = vmatpush.msrb.mxu1 %v211_v16  ;;  %v268_v45 = vld [vmem:[%s2504_s0 + $0x470] sm:$0xff]  ;;  %vm2346_vm9 = vcmp.eq.s32.totalorder %v2102_v13, %v112_v34  ;;  %vm2351_vm10 = vcmp.eq.s32.totalorder %v2102_v13, %v110_v41  ;;  %v239_v36 = vld [vmem:[%s2504_s0 + $0x388] sm:$0xff]  ;;  %vm2374_vm11 = vcmp.eq.s32.totalorder %v2102_v13, %v113_v42  ;;  %v238_v62 = vld [vmem:[%s2504_s0 + $0x380] sm:$0xff] }
  0x3c   :  { %1619 = vmatpush.msrb.mxu0 %v192_v20  ;;  %1658 = vmatpush.msrb.mxu2 %v225_v21  ;;  %v208_v50 = vld [vmem:[%s2504_s0 + $0x290] sm:$0xff]  ;;  %v1806_v52 = vsel %vm2351_vm10, 1.0, %v1851_v32  ;;  %v1808_v53 = vsel %vm2346_vm9, 1.0, %v1851_v32  ;;  %vm2379_vm12 = vcmp.eq.s32.totalorder %v2102_v13, %v111_v48  ;;  %v267_v58 = vld [vmem:[%s2504_s0 + $0x468] sm:$0xff]  ;;  %v1809_v13 = vsel %vm2374_vm11, 1.0, %v1851_v32  ;;  %v266_v2 = vld [vmem:[%s2504_s0 + $0x460] sm:$0xff] }
  0x3d   :  { %1677 = vmatpush.msrb.mxu3 %v242_v23  ;;  %1810 = vmatmul.msk.f32.vlgmr.msra.gmra.mxu0 %vm2143_vm2, %v1852_v26  ;;  %v1512_v57 = vsel %vm1496_vm0, %v1806_v52, 0.0  ;;  %v207_v59 = vld [vmem:[%s2504_s0 + $0x288] sm:$0xff]  ;;  %v1807_v60 = vsel %vm2379_vm12, 1.0, %v1851_v32  ;;  %v1516_v0 = vsel %vm1496_vm0, %v1808_v53, 0.0  ;;  %v206_v4 = vld [vmem:[%s2504_s0 + $0x280] sm:$0xff]  ;;  %v1518_v5 = vsel %vm1496_vm0, %v1809_v13, 0.0 }
  0x3e   :  { %1620 = vmatpush.msrb.mxu0 %v191_v29  ;;  %1813 = vmatmul.msk.f32.vlgmr.msra.gmra.mxu3 %vm2161_vm3, %v1852_v26  ;;  %v1513_v61 = vadd.f32 %v1512_v57, %v1511_v54  ;;  %v1514_v63 = vsel %vm1496_vm0, %v1807_v60, 0.0  ;;  %v265_v6 = vld [vmem:[%s2504_s0 + $0x458] sm:$0xff]  ;;  %v275_v8 = vld [vmem:[%s2504_s0 + $0x4a8] sm:$0xff]  ;;  %v264_v49 = vld [vmem:[%s2504_s0 + $0x450] sm:$0xff] }
  0x3f   :  { %1637 = vmatpush.msrb.mxu1 %v210_v27  ;;  %1659 = vmatpush.msrb.mxu2 %v224_v33  ;;  %v274_v10 = vld [vmem:[%s2504_s0 + $0x4a0] sm:$0xff]  ;;  %v263_v11 = vld [vmem:[%s2504_s0 + $0x448] sm:$0xff]  ;;  %v273_v12 = vld [vmem:[%s2504_s0 + $0x498] sm:$0xff] }
  0x40   :  { %1621 = vmatpush.msrb.mxu0 %v190_v37  ;;  %1678 = vmatpush.msrb.mxu3 %v241_v38  ;;  %v1515_v3 = vadd.f32 %v1514_v63, %v1513_v61  ;;  %v262_v1 = vld [vmem:[%s2504_s0 + $0x440] sm:$0xff]  ;;  %v272_v14 = vld [vmem:[%s2504_s0 + $0x490] sm:$0xff]  ;;  %v261_v15 = vld [vmem:[%s2504_s0 + $0x438] sm:$0xff] }
  0x41   :  { %1811 = vmatmul.msk.f32.vlgmr.msra.gmra.mxu1 %vm2166_vm4, %v1852_v26  ;;  %1660 = vmatpush.msrb.mxu2 %v223_v44  ;;  %v271_v17 = vld [vmem:[%s2504_s0 + $0x488] sm:$0xff]  ;;  %v260_v18 = vld [vmem:[%s2504_s0 + $0x430] sm:$0xff]  ;;  %v270_v19 = vld [vmem:[%s2504_s0 + $0x480] sm:$0xff] }
  0x42   :  { %1686 = vmatpush.msra.mxu0 %v269_v40  ;;  %1638 = vmatpush.msrb.mxu1 %v209_v43  ;;  %v1517_v7 = vadd.f32 %v1516_v0, %v1515_v3  ;;  %v259_v16 = vld [vmem:[%s2504_s0 + $0x428] sm:$0xff]  ;;  %v258_v20 = vld [vmem:[%s2504_s0 + $0x420] sm:$0xff]  ;;  %v257_v21 = vld [vmem:[%s2504_s0 + $0x418] sm:$0xff] }
  0x43   :  { %1679 = vmatpush.msrb.mxu3 %v240_v35  ;;  %1661 = vmatpush.msrb.mxu2 %v222_v51  ;;  %v256_v22 = vld [vmem:[%s2504_s0 + $0x410] sm:$0xff]  ;;  %v255_v23 = vld [vmem:[%s2504_s0 + $0x408] sm:$0xff]  ;;  %v254_v24 = vld [vmem:[%s2504_s0 + $0x400] sm:$0xff] }
  0x44   :  { %1687 = vmatpush.msra.mxu0 %v268_v45  ;;  %1639 = vmatpush.msrb.mxu1 %v208_v50  ;;  %v1519_v9 = vadd.f32 %v1518_v5, %v1517_v7  ;;  %v1471_v27 = vld [vmem:[%s2507_s3] sm:$0x3] }
  0x45   :  { %1680 = vmatpush.msrb.mxu3 %v239_v36  ;;  %1816 = vmatmul.msk.f32.vlgmr.msrb.gmra.mxu2 %vm2266_vm7, %v1852_v26  ;;  %v1525_v52 = vld [vmem:[#allocation2] sm:$0x3] }
  0x46   :  { %1688 = vmatpush.msra.mxu0 %v267_v58  ;;  %1640 = vmatpush.msrb.mxu1 %v207_v59 }
  0x47   :  { %1681 = vmatpush.msrb.mxu3 %v238_v62  ;;  %1814 = vmatmul.msk.f32.vlgmr.msrb.gmra.mxu0 %vm2198_vm5, %v1852_v26 }
  0x48   :  { %1817 = vmatmul.msk.f32.vlgmr.msrb.gmra.mxu3 %vm2295_vm8, %v1852_v26  ;;  %1689 = vmatpush.msra.mxu0 %v266_v2 }
  0x49   :  { %1641 = vmatpush.msrb.mxu1 %v206_v4  ;;  %1741 = vmatpush.msra.mxu2 %v1851_v32 }
  0x4a   :  { %1815 = vmatmul.msk.f32.vlgmr.msrb.gmra.mxu1 %vm2234_vm6, %v1852_v26  ;;  %1690 = vmatpush.msra.mxu0 %v265_v6 }
  0x4b   :  { %1716 = vmatpush.msra.mxu1 %v275_v8  ;;  %1761 = vmatpush.msra.mxu3 %v1851_v32 }
  0x4c   :  { %1691 = vmatpush.msra.mxu0 %v264_v49  ;;  %1520 = vadd.xlane.f32.xlu0 %v1519_v9 }
  0x4d   :  { %1717 = vmatpush.msra.mxu1 %v274_v10  ;;  %1820 = vmatmul.msk.f32.vlgmr.msra.gmra.mxu2 %vm2346_vm9, %v1852_v26 }
  0x4e   :  { %1692 = vmatpush.msra.mxu0 %v263_v11 }
  0x4f   :  { %1718 = vmatpush.msra.mxu1 %v273_v12 }
  0x50   :  { %1693 = vmatpush.msra.mxu0 %v262_v1  ;;  %1821 = vmatmul.msk.f32.vlgmr.msra.gmra.mxu3 %vm2374_vm11, %v1852_v26 }
  0x51   :  { %1719 = vmatpush.msra.mxu1 %v272_v14 }
  0x52   :  { %1694 = vmatpush.msra.mxu0 %v261_v15 }
  0x53   :  { %1720 = vmatpush.msra.mxu1 %v271_v17 }
  0x54   :  { %1695 = vmatpush.msra.mxu0 %v260_v18 }
  0x55   :  { %1721 = vmatpush.msra.mxu1 %v270_v19 }
  0x56   :  { %1696 = vmatpush.msra.mxu0 %v259_v16  ;;  %1819 = vmatmul.msk.f32.vlgmr.msra.gmra.mxu1 %vm2379_vm12, %v1852_v26 }
  0x58   :  { %1697 = vmatpush.msra.mxu0 %v258_v20 }
  0x5a   :  { %1698 = vmatpush.msra.mxu0 %v257_v21 }
  0x5c   :  { %1699 = vmatpush.msra.mxu0 %v256_v22 }
  0x5e   :  { %1700 = vmatpush.msra.mxu0 %v255_v23 }
  0x60   :  { %1701 = vmatpush.msra.mxu0 %v254_v24 }
  0x61   :  { %1818 = vmatmul.msk.f32.vlgmr.msra.gmra.mxu0 %vm2351_vm10, %v1852_v26 }
  0xba   :  { %v1543_v29 = vpop.f32.mrf.mxu0 }
  0xbe   :  { %v1563_v25 = vpop.f32.mrf.mxu1  ;;  %v1583_v31 = vpop.f32.mrf.mxu2 }
  0xbf   :  { %v1564_v30 = vadd.f32 %v1563_v25, %v1543_v29  ;;  %v1521_v33 = vpop.xlane.xlu0 %1520 }
  0xc0   :  { %v1522_v26 = vadd.f32 %v1521_v33, %v1471_v27 }
  0xc1   :  { %v1584_v34 = vadd.f32 %v1583_v31, %v1564_v30  ;;  %v1603_v37 = vpop.f32.mrf.mxu3 }
  0xc2   :  { %1524 = vst.msk [vmem:[%s2507_s3] sm:$0x3] %vm91_vm14, %v1522_v26 }
  0xc3   :  { %v1604_v38 = vadd.f32 %v1603_v37, %v1584_v34 }
  0xc4   :  { %v1623_v39 = vpop.f32.mrf.mxu0 }
  0xc5   :  { %v1624_v40 = vadd.f32 %v1623_v39, %v1604_v38 }
  0xc7   :  { %v1643_v32 = vpop.f32.mrf.mxu1 }
  0xc8   :  { %v1644_v28 = vadd.f32 %v1643_v32, %v1624_v40  ;;  %v1663_v41 = vpop.f32.mrf.mxu2 }
  0xca   :  { %v1664_v42 = vadd.f32 %v1663_v41, %v1644_v28 }
  0xcb   :  { %v1683_v43 = vpop.f32.mrf.mxu3 }
  0xcc   :  { %v1684_v44 = vadd.f32 %v1683_v43, %v1664_v42 }
  0xd0   :  { %v1743_v47 = vpop.f32.mrf.mxu2 }
  0xd3   :  { %v1723_v45 = vpop.f32.mrf.mxu1  ;;  %v1763_v50 = vpop.f32.mrf.mxu3 }
  0xde   :  { %v1703_v35 = vpop.f32.mrf.mxu0 }
  0xdf   :  { %v1704_v46 = vadd.f32 %v1703_v35, %v1684_v44 }
  0xe1   :  { %v1724_v48 = vadd.f32 %v1723_v45, %v1704_v46 }
  0xe3   :  { %v1744_v51 = vadd.f32 %v1743_v47, %v1724_v48 }
  0xe5   :  { %v1764_v53 = vadd.f32 %v1763_v50, %v1744_v51 }
  0xe7   :  { %v1766_v54 = vadd.f32 %v1764_v53, %v1525_v52 }
  0xe9   :  { %1768 = vst.msk [vmem:[#allocation2] sm:$0x3] %vm89_vm13, %v1766_v54 }
  0xea   :  { %1779 = dma.vmem_to_hbm [thread:$0]  %s1775_s22, 32, %s1777_s24, [#allocation3]  }
  0xeb   :  { %1849 = dma.done.wait [#allocation3], 32  }
  0xec   :  { %1850 = vsyncadd [#allocation3], 4294967264 }
  0xed   :  { %1788 = vsyncpa [#allocation3], 1 }

</bundles_post_ra>
